<compile_context>
chip_gen: v7x
topology: tpu7x:2x2x1
jax: 0.10.0
libtpu: 0.0.40
codegen_flags: <defaults>
</compile_context>

<pallas_src>
import functools

import jax
import jax.numpy as jnp
from jax import lax
from jax.experimental import pallas as pl
from jax.experimental.pallas import tpu as pltpu

H_PAD = 128  # lane-dense feature width (one full vreg lane dimension)


def _pad_to(arr, rows, cols):
    """Zero-pad a 2-D array up to (rows, cols)."""
    pr, pc = rows - arr.shape[0], cols - arr.shape[1]
    if pr == 0 and pc == 0:
        return arr
    return jnp.pad(arr, ((0, pr), (0, pc)))


def _gnn_eval(a_bf16, x_bf16, w1_bf16, b1_f32, w2_bf16, b2_f32):
    """One 2-layer GCN evaluation, all operands already in VMEM.

    o = A @ (relu(A @ (X @ W1) + b1) @ W2) + b2
    Matmul operands are bf16 (MXU-native); accumulation, bias add and ReLU are
    f32.  Biases are already (N, H_PAD) -- no broadcast here.  x is lane-dense
    [N, 128]; padded columns stay zero (W/b padded columns are zero).
    """
    bf = jnp.bfloat16
    f32 = jnp.float32
    xw1 = jnp.dot(x_bf16, w1_bf16, preferred_element_type=f32)
    h = jnp.dot(a_bf16, xw1.astype(bf), preferred_element_type=f32) + b1_f32
    h = jnp.maximum(h, 0.0)
    hw2 = jnp.dot(h.astype(bf), w2_bf16, preferred_element_type=f32)
    return jnp.dot(a_bf16, hw2.astype(bf), preferred_element_type=f32) + b2_f32


def _gde_forward_kernel(a_ref, x_ref, w1_ref, b1_ref, w2_ref, b2_ref, o_ref):
    """Single gnn(x) evaluation (== GDEFunc.forward).  x_ref is bf16."""
    o_ref[...] = _gnn_eval(a_ref[...], x_ref[...], w1_ref[...], b1_ref[...],
                           w2_ref[...], b2_ref[...])


def _gde_euler_kernel(a_ref, x_ref, w1_ref, b1_ref, w2_ref, b2_ref, o_ref, *,
                      dt, n_steps):
    """Fused fixed-step Euler: x_{k+1} = x_k + dt * gnn(x_k), all steps inside
    one kernel.  A_hat / weights / pre-broadcast biases are read from VMEM once
    and reused every step.  The loop is fully unrolled (small static n_steps)
    so the scheduler overlaps casts/VPU work of step k+1 with the MXU of step k.
    NOTE: dt / n_steps are static -> a new (dt, n_steps) pair recompiles."""
    a = a_ref[...]
    w1, w2 = w1_ref[...], w2_ref[...]
    b1, b2 = b1_ref[...], b2_ref[...]  # already (N, H_PAD): no per-iter broadcast

    def body(_, x):
        return x + dt * _gnn_eval(a, x.astype(jnp.bfloat16), w1, b1, w2, b2)

    x_final = lax.fori_loop(0, n_steps, body, x_ref[...], unroll=True)
    o_ref[...] = x_final


def _full_spec(shape):
    return pl.BlockSpec(shape, lambda: (0,) * len(shape))


# Fine for all generations at this size; the tiled large-N path re-derives this
# per chip (v5e default scoped VMEM is only 16 MiB; v7x physical is 64 MiB).
_COMPILER_PARAMS = pltpu.CompilerParams(vmem_limit_bytes=32 * 1024 * 1024)


def _gcn_cost(n, n_steps, x_bytes_per_elem):
    """Advisory cost estimate: 2x (N,HPAD)x(HPAD,HPAD) + 2x (N,N)x(N,HPAD)."""
    flops_per_step = 4 * n * H_PAD * (H_PAD + n)
    bytes_accessed = (n * n * 2                    # A_hat bf16
                      + 2 * H_PAD * H_PAD * 2      # W1, W2 bf16
                      + 2 * n * H_PAD * 4          # b1, b2 f32 (pre-broadcast)
                      + n * H_PAD * x_bytes_per_elem   # x in
                      + n * H_PAD * 4)             # out f32
    return pl.CostEstimate(flops=n_steps * flops_per_step, transcendentals=0,
                           bytes_accessed=bytes_accessed)


def _gde_forward_call(a, x_bf16, w1, b1, w2, b2):
    n = x_bf16.shape[0]
    return pl.pallas_call(
        _gde_forward_kernel,
        out_shape=jax.ShapeDtypeStruct((n, H_PAD), jnp.float32),
        grid=(),
        in_specs=[_full_spec(op.shape) for op in (a, x_bf16, w1, b1, w2, b2)],
        out_specs=_full_spec((n, H_PAD)),
        compiler_params=_COMPILER_PARAMS,
        cost_estimate=_gcn_cost(n, 1, 2),
    )(a, x_bf16, w1, b1, w2, b2)


def _gde_euler_call(a, x_f32, w1, b1, w2, b2, *, dt, n_steps):
    n = x_f32.shape[0]
    kernel = functools.partial(_gde_euler_kernel, dt=dt, n_steps=n_steps)
    return pl.pallas_call(
        kernel,
        out_shape=jax.ShapeDtypeStruct((n, H_PAD), jnp.float32),
        grid=(),
        in_specs=[_full_spec(op.shape) for op in (a, x_f32, w1, b1, w2, b2)],
        out_specs=_full_spec((n, H_PAD)),
        # Alias the padded f32 Euler state onto the output: no fresh HBM
        # output allocation / extra writeback buffer on this latency-bound path.
        input_output_aliases={1: 0},
        compiler_params=_COMPILER_PARAMS,
        cost_estimate=_gcn_cost(n, n_steps, 4),
    )(a, x_f32, w1, b1, w2, b2)


class GDEFunc:
    """JAX/Pallas equivalent of torchgde GDEFunc: forward(t, x) = gnn(x).

    The gnn is the canonical 2-layer GCN.  Parameters are padded once to the
    lane-dense 128-wide layout, pre-cast to bf16, and the biases are
    pre-broadcast to (N, H_PAD) at construction.
    """

    def __init__(self, a_hat, w1, b1, w2, b2):
        n = a_hat.shape[0]
        if a_hat.shape != (n, n):
            raise ValueError(f"a_hat must be square, got {a_hat.shape}")
        if max(w1.shape + w2.shape) > H_PAD:
            raise ValueError(f"feature dims must be <= {H_PAD}")
        self.n = n
        self.h_in = w1.shape[0]
        self.h_out = w2.shape[1]
        self.a = a_hat.astype(jnp.bfloat16)
        self.w1 = _pad_to(w1, H_PAD, H_PAD).astype(jnp.bfloat16)
        self.w2 = _pad_to(w2, H_PAD, H_PAD).astype(jnp.bfloat16)
        # Pre-broadcast biases ONCE (hoisted out of the solver loop).
        self.b1 = jnp.broadcast_to(
            _pad_to(b1.astype(jnp.float32), 1, H_PAD), (n, H_PAD)) + 0.0
        self.b2 = jnp.broadcast_to(
            _pad_to(b2.astype(jnp.float32), 1, H_PAD), (n, H_PAD)) + 0.0
        # Host-side counter, exactly as in the PyTorch module.  NOTE: it will
        # not track evaluations traced under jit/scan (same caveat as torch).
        self.nfe = 0

    def __call__(self, t, x):
        """forward(t, x) = gnn(x); t unused (autonomous ODE func)."""
        del t
        self.nfe += 1
        if x.shape != (self.n, self.h_in):
            raise ValueError(f"expected x of shape {(self.n, self.h_in)}, "
                             f"got {x.shape}")
        # Feed x to the kernel already in bf16: it only feeds a bf16 MXU matmul,
        # so the f32 copy would double x's DMA bytes on a launch/DMA-bound call.
        x_pad = _pad_to(x.astype(jnp.bfloat16), self.n, H_PAD)
        out = _gde_forward_call(self.a, x_pad, self.w1, self.b1, self.w2, self.b2)
        return out[:, : self.h_out]

    def integrate_euler(self, x0, dt, n_steps):
        """All n_steps gnn evaluations fused into ONE pallas_call (what an
        ODEBlock's fixed-step solver would otherwise issue one-by-one).  The
        state stays in the padded (N, 128) f32 layout for the whole call; the
        pad/slice round trip is paid exactly once."""
        self.nfe += int(n_steps)
        if x0.shape != (self.n, self.h_in):
            raise ValueError(f"expected x0 of shape {(self.n, self.h_in)}, "
                             f"got {x0.shape}")
        x_pad = _pad_to(x0.astype(jnp.float32), self.n, H_PAD)
        out = _gde_euler_call(self.a, x_pad, self.w1, self.b1, self.w2, self.b2,
                              dt=float(dt), n_steps=int(n_steps))
        return out[:, : self.h_out]


def _make_normalized_adjacency(key, n):
    """Deterministic Erdos-Renyi graph -> D^-1/2 (A + I) D^-1/2."""
    u = jax.random.uniform(key, (n, n))
    upper = jnp.triu(u < 0.1, k=1).astype(jnp.float32)
    adj = upper + upper.T + jnp.eye(n, dtype=jnp.float32)
    deg = jnp.sum(adj, axis=1)
    d_inv_sqrt = 1.0 / jnp.sqrt(deg)
    return adj * d_inv_sqrt[:, None] * d_inv_sqrt[None, :]


def _reference_gnn(a_hat, x, w1, b1, w2, b2, matmul_dtype):
    """Pure-JAX reference with the same matmul input dtype as the kernel."""
    def mm(p, q):
        return jnp.dot(p.astype(matmul_dtype), q.astype(matmul_dtype),
                       preferred_element_type=jnp.float32)
    h = jnp.maximum(mm(a_hat, mm(x, w1)) + b1, 0.0)
    return mm(a_hat, mm(h, w2)) + b2


if __name__ == "__main__":
    N = 64   # nodes
    H = 32   # hidden feature dim

    key = jax.random.PRNGKey(0)
    k_adj, k_x, k_w1, k_b1, k_w2, k_b2 = jax.random.split(key, 6)

    a_hat = _make_normalized_adjacency(k_adj, N)
    x = jax.random.normal(k_x, (N, H), dtype=jnp.float32)
    w1 = jax.random.normal(k_w1, (H, H), dtype=jnp.float32) / jnp.sqrt(H)
    b1 = 0.1 * jax.random.normal(k_b1, (1, H), dtype=jnp.float32)
    w2 = jax.random.normal(k_w2, (H, H), dtype=jnp.float32) / jnp.sqrt(H)
    b2 = 0.1 * jax.random.normal(k_b2, (1, H), dtype=jnp.float32)

    gde_func = GDEFunc(a_hat, w1, b1, w2, b2)

    # ---- single forward evaluation (matches GDEFunc.forward semantics) ----
    t = jnp.float32(0.0)
    out = jax.block_until_ready(gde_func(t, x))
    assert out.shape == (N, H)
    assert gde_func.nfe == 1

    ref_bf16 = _reference_gnn(a_hat, x, w1, b1, w2, b2, matmul_dtype=jnp.bfloat16)
    ref_f32 = _reference_gnn(a_hat, x, w1, b1, w2, b2, matmul_dtype=jnp.float32)
    assert jnp.allclose(out, ref_bf16, atol=2e-3, rtol=2e-3)
    # Looser bound vs a pure-f32 reference (bf16 MXU inputs, f32 accumulate).
    assert jnp.allclose(out, ref_f32, atol=1e-1, rtol=1e-1)

    # ---- fused multi-step path: k solver evaluations in ONE pallas_call ----
    n_steps, dt = 8, 0.05
    out_int = jax.block_until_ready(gde_func.integrate_euler(x, dt, n_steps))
    assert out_int.shape == (N, H)
    assert gde_func.nfe == 1 + n_steps

    x_expect = x
    for _ in range(n_steps):
        x_expect = x_expect + dt * _reference_gnn(
            a_hat, x_expect, w1, b1, w2, b2, matmul_dtype=jnp.bfloat16)
    assert jnp.allclose(out_int, x_expect, atol=1e-2, rtol=1e-2)

    print("KERNEL_OK")
</pallas_src>

<mosaic_0001>
module attributes {stable_mosaic.version = 11 : i64} {
  func.func @_gde_forward_kernel(%arg0: memref<64x64xbf16, #tpu.memory_space<vmem>>, %arg1: memref<64x128xbf16, #tpu.memory_space<vmem>>, %arg2: memref<128x128xbf16, #tpu.memory_space<vmem>>, %arg3: memref<64x128xf32, #tpu.memory_space<vmem>>, %arg4: memref<128x128xbf16, #tpu.memory_space<vmem>>, %arg5: memref<64x128xf32, #tpu.memory_space<vmem>>, %arg6: memref<64x128xf32, #tpu.memory_space<vmem>>) attributes {dimension_semantics = [], scalar_prefetch = 0 : i64, scratch_operands = 0 : i64, tpu.core_type = #tpu.core_type<tc>} {
    %c0 = arith.constant 0 : index
    %c0_0 = arith.constant 0 : index
    %0 = vector.load %arg0[%c0, %c0_0] : memref<64x64xbf16, #tpu.memory_space<vmem>>, vector<64x64xbf16>
    %c0_1 = arith.constant 0 : index
    %c0_2 = arith.constant 0 : index
    %1 = vector.load %arg1[%c0_1, %c0_2] : memref<64x128xbf16, #tpu.memory_space<vmem>>, vector<64x128xbf16>
    %c0_3 = arith.constant 0 : index
    %c0_4 = arith.constant 0 : index
    %2 = vector.load %arg2[%c0_3, %c0_4] : memref<128x128xbf16, #tpu.memory_space<vmem>>, vector<128x128xbf16>
    %c0_5 = arith.constant 0 : index
    %c0_6 = arith.constant 0 : index
    %3 = vector.load %arg3[%c0_5, %c0_6] : memref<64x128xf32, #tpu.memory_space<vmem>>, vector<64x128xf32>
    %c0_7 = arith.constant 0 : index
    %c0_8 = arith.constant 0 : index
    %4 = vector.load %arg4[%c0_7, %c0_8] : memref<128x128xbf16, #tpu.memory_space<vmem>>, vector<128x128xbf16>
    %c0_9 = arith.constant 0 : index
    %c0_10 = arith.constant 0 : index
    %5 = vector.load %arg5[%c0_9, %c0_10] : memref<64x128xf32, #tpu.memory_space<vmem>>, vector<64x128xf32>
    %cst = arith.constant dense<0.000000e+00> : vector<64x128xf32>
    %6 = tpu.matmul %1, %2, %cst {dimension_numbers = #tpu.dot_dimension_numbers<[1], [0], [0], [1], [0, 0, 1, 1], [], []>} : vector<64x128xbf16>, vector<128x128xbf16>, vector<64x128xf32> -> vector<64x128xf32>
    %7 = arith.truncf %6 : vector<64x128xf32> to vector<64x128xbf16>
    %cst_11 = arith.constant dense<0.000000e+00> : vector<64x128xf32>
    %8 = tpu.matmul %0, %7, %cst_11 {dimension_numbers = #tpu.dot_dimension_numbers<[1], [0], [0], [1], [0, 0, 1, 1], [], []>} : vector<64x64xbf16>, vector<64x128xbf16>, vector<64x128xf32> -> vector<64x128xf32>
    %9 = arith.addf %8, %3 : vector<64x128xf32>
    %cst_12 = arith.constant 0.000000e+00 : f32
    %10 = vector.broadcast %cst_12 : f32 to vector<64x128xf32>
    %11 = arith.maximumf %9, %10 : vector<64x128xf32>
    %12 = arith.truncf %11 : vector<64x128xf32> to vector<64x128xbf16>
    %cst_13 = arith.constant dense<0.000000e+00> : vector<64x128xf32>
    %13 = tpu.matmul %12, %4, %cst_13 {dimension_numbers = #tpu.dot_dimension_numbers<[1], [0], [0], [1], [0, 0, 1, 1], [], []>} : vector<64x128xbf16>, vector<128x128xbf16>, vector<64x128xf32> -> vector<64x128xf32>
    %14 = arith.truncf %13 : vector<64x128xf32> to vector<64x128xbf16>
    %cst_14 = arith.constant dense<0.000000e+00> : vector<64x128xf32>
    %15 = tpu.matmul %0, %14, %cst_14 {dimension_numbers = #tpu.dot_dimension_numbers<[1], [0], [0], [1], [0, 0, 1, 1], [], []>} : vector<64x64xbf16>, vector<64x128xbf16>, vector<64x128xf32> -> vector<64x128xf32>
    %16 = arith.addf %15, %5 : vector<64x128xf32>
    %c0_15 = arith.constant 0 : index
    %c0_16 = arith.constant 0 : index
    %17 = vector.load %arg6[%c0_15, %c0_16] : memref<64x128xf32, #tpu.memory_space<vmem>>, vector<64x128xf32>
    tpu.vector_store %arg6[%c0_15, %c0_16], %16 {strides = array<i32>} : memref<64x128xf32, #tpu.memory_space<vmem>>, vector<64x128xf32>,
    return
  }
}

</mosaic_0001>

<bundles_post_ra>
// kernel: tpu_custom_call.1
= control target key start
LH: loop header
LB: loop body
LE: loop exit
PB: predicated region body
PF: predicated region fallthrough
CT: control target
= control target key end

     0   :  { %11 = vsyncpa [#allocation3], 0  ;;  %s1175_s0 = inlined_call_operand.hbm [shape: bf16[64,64], index: 0, kind: input, shape index: {}]   ;;  %s1176_s1 = inlined_call_operand.hbm [shape: bf16[64,128], index: 1, kind: input, shape index: {}]   ;;  %s1177_s2 = inlined_call_operand.hbm [shape: bf16[128,128], index: 2, kind: input, shape index: {}]   ;;  %s1178_s3 = inlined_call_operand.hbm [shape: f32[64,128], index: 3, kind: input, shape index: {}]   ;;  %s1179_s4 = inlined_call_operand.hbm [shape: bf16[128,128], index: 4, kind: input, shape index: {}]   ;;  %s1180_s5 = inlined_call_operand.hbm [shape: f32[64,128], index: 5, kind: input, shape index: {}]   ;;  %s1181_s6 = inlined_call_operand.hbm [shape: f32[64,128], index: 6, kind: output, shape index: {}]  }
   0x1   :  { %12 = vsyncpa [#allocation6], 0 }
   0x2   :  { %13 = vsyncpa [#allocation9], 0 }
   0x3   :  { %14 = vsyncpa [#allocation12], 0 }
   0x4   :  { %15 = vsyncpa [#allocation4], 0  ;;  %s983_s21 = smov [#allocation5]   ;;  %s984_s23 = smov [#allocation8]  }
   0x5   :  { %s33_s22 = sshll.u32 %s983_s21, 4  ;;  %s57_s24 = sshll.u32 %s984_s23, 4  ;;  %s34_s22 = int_to_ptr.vmem [resolvable:$true] %s33_s22  ;;  %s1029_s24 = int_to_ptr.vmem [resolvable:$true] %s57_s24 }
   0x6   :  { %s819_s27 = scalar_lea.hbm %s1176_s1, 512 }
   0x7   :  { %p820_p0 = scmp.ne.s32.totalorder %s1176_s1, %s819_s27  ;;  %p823_p1 = scmp.lt.u32.totalorder %s819_s27, %s1176_s1 }
   0x9   :  { %p825_p2 = pnand %p823_p1, %p820_p0 }
   0xb   :  { %828 = shalt.err (!%p825_p2)
}
   0xc   :  { %s829_s8 = scalar_lea.vmem %s34_s22, 512  ;;  %p834_p4 = scmp.lt.s32.totalorder %s34_s22, %s34_s22 }
   0xd   :  { %p830_p3 = scmp.ne.s32.totalorder %s34_s22, %s829_s8  ;;  %p835_p5 = scmp.lt.s32.totalorder %s829_s8, %s829_s8 }
   0xf   :  { %p836_p6 = por %p835_p5, %p834_p4 }
  0x11   :  { %p837_p7 = pnand %p836_p6, %p830_p3 }
  0x13   :  { %840 = shalt.err (!%p837_p7)
}
  0x14   :  { %s985_s9 = smov 64   ;;  %s986_s10 = smov 4  }
  0x15   :  { %39 = dma.hbm_to_vmem [thread:$0]  %s1176_s1, 512, %s34_s22, [#allocation6], %s985_s9, %s985_s9, %s986_s10  }
  0x16   :  { %s841_s15 = scalar_lea.hbm %s1178_s3, 1024 }
  0x17   :  { %p842_p8 = scmp.ne.s32.totalorder %s1178_s3, %s841_s15  ;;  %p845_p9 = scmp.lt.u32.totalorder %s841_s15, %s1178_s3 }
  0x19   :  { %p847_p10 = pnand %p845_p9, %p842_p8 }
  0x1b   :  { %850 = shalt.err (!%p847_p10)
}
  0x1c   :  { %s851_s20 = scalar_lea.vmem %s1029_s24, 1024  ;;  %p856_p12 = scmp.lt.s32.totalorder %s1029_s24, %s1029_s24 }
  0x1d   :  { %p852_p11 = scmp.ne.s32.totalorder %s1029_s24, %s851_s20  ;;  %p857_p13 = scmp.lt.s32.totalorder %s851_s20, %s851_s20 }
  0x1f   :  { %p858_p0 = por %p857_p13, %p856_p12 }
  0x21   :  { %p859_p1 = pnand %p858_p0, %p852_p11 }
  0x23   :  { %862 = shalt.err (!%p859_p1)
}
  0x24   :  { %s987_s1 = smov 128   ;;  %s988_s21 = smov 8  }
  0x25   :  { %63 = dma.hbm_to_vmem [thread:$0]  %s1178_s3, 1024, %s1029_s24, [#allocation9], %s987_s1, %s987_s1, %s988_s21  }
  0x26   :  { %s989_s25 = smov [#allocation2]   ;;  %s990_s27 = smov [#allocation7]  }
  0x27   :  { %s21_s26 = sshll.u32 %s989_s25, 4  ;;  %s45_s28 = sshll.u32 %s990_s27, 4  ;;  %s22_s26 = int_to_ptr.vmem [resolvable:$true] %s21_s26  ;;  %s1066_s28 = int_to_ptr.vmem [resolvable:$true] %s45_s28 }
  0x28   :  { %s863_s7 = scalar_lea.hbm %s1175_s0, 512 }
  0x29   :  { %p864_p2 = scmp.ne.s32.totalorder %s1175_s0, %s863_s7  ;;  %p867_p3 = scmp.lt.u32.totalorder %s863_s7, %s1175_s0 }
  0x2b   :  { %p869_p4 = pnand %p867_p3, %p864_p2 }
  0x2d   :  { %872 = shalt.err (!%p869_p4)
}
  0x2e   :  { %s873_s3 = scalar_lea.vmem %s22_s26, 512  ;;  %p878_p6 = scmp.lt.s32.totalorder %s22_s26, %s22_s26 }
  0x2f   :  { %p874_p5 = scmp.ne.s32.totalorder %s22_s26, %s873_s3  ;;  %p879_p7 = scmp.lt.s32.totalorder %s873_s3, %s873_s3 }
  0x31   :  { %p880_p8 = por %p879_p7, %p878_p6 }
  0x33   :  { %p881_p9 = pnand %p880_p8, %p874_p5 }
  0x35   :  { %884 = shalt.err (!%p881_p9)
}
  0x36   :  { %27 = dma.hbm_to_vmem [thread:$0]  %s1175_s0, 512, %s22_s26, [#allocation3], %s985_s9, %s985_s9, %s986_s10  }
  0x37   :  { %s885_s17 = scalar_lea.hbm %s1177_s2, 1024 }
  0x38   :  { %p886_p10 = scmp.ne.s32.totalorder %s1177_s2, %s885_s17  ;;  %p889_p11 = scmp.lt.u32.totalorder %s885_s17, %s1177_s2 }
  0x3a   :  { %p891_p12 = pnand %p889_p11, %p886_p10 }
  0x3c   :  { %894 = shalt.err (!%p891_p12)
}
  0x3d   :  { %s895_s23 = scalar_lea.vmem %s1066_s28, 1024  ;;  %p900_p0 = scmp.lt.s32.totalorder %s1066_s28, %s1066_s28 }
  0x3e   :  { %p896_p13 = scmp.ne.s32.totalorder %s1066_s28, %s895_s23  ;;  %p901_p1 = scmp.lt.s32.totalorder %s895_s23, %s895_s23 }
  0x40   :  { %p902_p2 = por %p901_p1, %p900_p0 }
  0x42   :  { %p903_p3 = pnand %p902_p2, %p896_p13 }
  0x44   :  { %906 = shalt.err (!%p903_p3)
}
  0x45   :  { %51 = dma.hbm_to_vmem [thread:$0]  %s1177_s2, 1024, %s1066_s28, [#allocation6], %s985_s9, %s985_s9, %s986_s10  }
  0x46   :  { %s991_s26 = smov [#allocation10]   ;;  %s992_s29 = smov [#allocation11]  }
  0x47   :  { %s69_s27 = sshll.u32 %s991_s26, 4  ;;  %s81_s30 = sshll.u32 %s992_s29, 4  ;;  %s70_s27 = int_to_ptr.vmem [resolvable:$true] %s69_s27  ;;  %s1103_s30 = int_to_ptr.vmem [resolvable:$true] %s81_s30 }
  0x48   :  { %s907_s11 = scalar_lea.hbm %s1179_s4, 1024 }
  0x49   :  { %p908_p4 = scmp.ne.s32.totalorder %s1179_s4, %s907_s11  ;;  %p911_p5 = scmp.lt.u32.totalorder %s907_s11, %s1179_s4 }
  0x4b   :  { %p913_p6 = pnand %p911_p5, %p908_p4 }
  0x4d   :  { %916 = shalt.err (!%p913_p6)
}
  0x4e   :  { %s917_s2 = scalar_lea.vmem %s70_s27, 1024  ;;  %p922_p8 = scmp.lt.s32.totalorder %s70_s27, %s70_s27 }
  0x4f   :  { %p918_p7 = scmp.ne.s32.totalorder %s70_s27, %s917_s2  ;;  %p923_p9 = scmp.lt.s32.totalorder %s917_s2, %s917_s2 }
  0x51   :  { %p924_p10 = por %p923_p9, %p922_p8 }
  0x53   :  { %p925_p11 = pnand %p924_p10, %p918_p7 }
  0x55   :  { %928 = shalt.err (!%p925_p11)
}
  0x56   :  { %75 = dma.hbm_to_vmem [thread:$0]  %s1179_s4, 1024, %s70_s27, [#allocation9], %s985_s9, %s985_s9, %s986_s10  }
  0x57   :  { %s929_s17 = scalar_lea.hbm %s1180_s5, 1024 }
  0x58   :  { %p930_p12 = scmp.ne.s32.totalorder %s1180_s5, %s929_s17  ;;  %p933_p13 = scmp.lt.u32.totalorder %s929_s17, %s1180_s5 }
  0x5a   :  { %p935_p0 = pnand %p933_p13, %p930_p12 }
  0x5c   :  { %938 = shalt.err (!%p935_p0)
}
  0x5d   :  { %s939_s23 = scalar_lea.vmem %s1103_s30, 1024  ;;  %p944_p2 = scmp.lt.s32.totalorder %s1103_s30, %s1103_s30 }
  0x5e   :  { %p940_p1 = scmp.ne.s32.totalorder %s1103_s30, %s939_s23  ;;  %p945_p3 = scmp.lt.s32.totalorder %s939_s23, %s939_s23 }
  0x60   :  { %p946_p4 = por %p945_p3, %p944_p2 }
  0x62   :  { %p947_p5 = pnand %p946_p4, %p940_p1 }
  0x64   :  { %950 = shalt.err (!%p947_p5)
}
  0x65   :  { %87 = dma.hbm_to_vmem [thread:$0]  %s1180_s5, 1024, %s1103_s30, [#allocation12], %s987_s1, %s987_s1, %s988_s21  }
  0x66   :  { %973 = dma.done.wait [#allocation3], 512  }
  0x67   :  { %974 = vsyncadd [#allocation3], 4294966784 }
  0x68   :  { %975 = dma.done.wait [#allocation6], 1536  }
  0x69   :  { %976 = vsyncadd [#allocation6], 4294965760 }
  0x6a   :  { %977 = dma.done.wait [#allocation9], 2048  }
  0x6b   :  { %978 = vsyncadd [#allocation9], 4294965248 }
  0x6c   :  { %979 = dma.done.wait [#allocation12], 1024  }
  0x6d   :  { %980 = vsyncadd [#allocation12], 4294966272  ;;  %v795_v0 = vld [vmem:[#allocation7] sm:$0xff]   ;;  %v796_v1 = vld [vmem:[#allocation7 + $0x8] sm:$0xff]   ;;  %vm332_vm0 = vcmask 523264   ;;  %s993_s5 = smov [#allocation13]  }
  0x6e   :  { %704 = vmatprep.subr.bf16.mxu0 %v795_v0  ;;  %v797_v2 = vld [vmem:[#allocation7 + $0x10] sm:$0xff]   ;;  %v798_v3 = vld [vmem:[#allocation7 + $0x18] sm:$0xff]   ;;  %v803_v4 = vld [vmem:[#allocation5] sm:$0xff]   ;;  %s617_s10 = sshll.u32 %s993_s5, 4  ;;  %s618_s10 = int_to_ptr.vmem [resolvable:$true] %s617_s10 }
  0x6f   :  { %705 = vmatpush3.bf16.msra.mxu0 %v795_v0  ;;  %720 = vmatprep.mubr.bf16.mxu0 %v803_v4  ;;  %v799_v5 = vld [vmem:[#allocation7 + $0x20] sm:$0xff]   ;;  %v800_v6 = vld [vmem:[#allocation7 + $0x28] sm:$0xff]   ;;  %v801_v7 = vld [vmem:[#allocation7 + $0x30] sm:$0xff]   ;;  %s951_s0 = scalar_lea.vmem %s618_s10, 1024  ;;  %p956_p7 = scmp.lt.s32.totalorder %s618_s10, %s618_s10 }
  0x70   :  { %706 = vmatprep.subr.bf16.mxu0 %v796_v1  ;;  %v802_v8 = vld [vmem:[#allocation7 + $0x38] sm:$0xff]   ;;  %v804_v9 = vld [vmem:[#allocation5 + $0x8] sm:$0xff]   ;;  %v805_v10 = vld [vmem:[#allocation5 + $0x10] sm:$0xff]   ;;  %p952_p6 = scmp.ne.s32.totalorder %s618_s10, %s951_s0  ;;  %p957_p8 = scmp.lt.s32.totalorder %s951_s0, %s951_s0 }
  0x71   :  { %v806_v11 = vld [vmem:[#allocation5 + $0x18] sm:$0xff]   ;;  %v807_v12 = vld [vmem:[#allocation2] sm:$0xff]   ;;  %v1142_v26 = vld [vmem:[#allocation2 + $0x8] sm:$0xff]  }
  0x72   :  { %736 = vmatprep.mubr.msk.bf16.mxu1 %vm332_vm0, %v807_v12  ;;  %v811_v25 = vld [vmem:[#allocation10] sm:$0xff]   ;;  %v1144_v27 = vld [vmem:[#allocation2 + $0x10] sm:$0xff]   ;;  %v812_v28 = vld [vmem:[#allocation10 + $0x8] sm:$0xff]   ;;  %p958_p9 = por %p957_p8, %p956_p7 }
  0x73   :  { %707 = vmatpush3.bf16.msra.mxu0 %v796_v1  ;;  %v813_v29 = vld [vmem:[#allocation10 + $0x10] sm:$0xff]   ;;  %v1150_v30 = vld [vmem:[#allocation2 + $0x18] sm:$0xff]   ;;  %v815_v32 = vld [vmem:[#allocation10 + $0x20] sm:$0xff]  }
  0x74   :  { %708 = vmatprep.subr.bf16.mxu0 %v797_v2  ;;  %v814_v31 = vld [vmem:[#allocation10 + $0x18] sm:$0xff]   ;;  %v816_v33 = vld [vmem:[#allocation10 + $0x28] sm:$0xff]   ;;  %v817_v34 = vld [vmem:[#allocation10 + $0x30] sm:$0xff]   ;;  %p959_p10 = pnand %p958_p9, %p952_p6 }
  0x75   :  { %v818_v35 = vld [vmem:[#allocation10 + $0x38] sm:$0xff]   ;;  %v141_v36 = vld [vmem:[#allocation8 + $0x10] sm:$0xff]  ;;  %v139_v37 = vld [vmem:[#allocation8] sm:$0xff] }
  0x76   :  { %v142_v39 = vld [vmem:[#allocation8 + $0x18] sm:$0xff]  ;;  %v140_v42 = vld [vmem:[#allocation8 + $0x8] sm:$0xff]  ;;  %v145_v52 = vld [vmem:[#allocation8 + $0x30] sm:$0xff] }
  0x77   :  { %709 = vmatpush3.bf16.msra.mxu0 %v797_v2  ;;  %v143_v54 = vld [vmem:[#allocation8 + $0x20] sm:$0xff]  ;;  %v146_v57 = vld [vmem:[#allocation8 + $0x38] sm:$0xff]  ;;  %v144_v60 = vld [vmem:[#allocation8 + $0x28] sm:$0xff] }
  0x78   :  { %710 = vmatprep.subr.bf16.mxu0 %v798_v3 }
  0x7b   :  { %711 = vmatpush3.bf16.msra.mxu0 %v798_v3 }
  0x7c   :  { %712 = vmatprep.subr.bf16.mxu0 %v799_v5 }
  0x7f   :  { %713 = vmatpush3.bf16.msra.mxu0 %v799_v5 }
  0x80   :  { %714 = vmatprep.subr.bf16.mxu0 %v800_v6 }
  0x83   :  { %715 = vmatpush3.bf16.msra.mxu0 %v800_v6 }
  0x84   :  { %716 = vmatprep.subr.bf16.mxu0 %v801_v7 }
  0x87   :  { %717 = vmatpush3.bf16.msra.mxu0 %v801_v7 }
  0x88   :  { %718 = vmatprep.subr.bf16.mxu0 %v802_v8 }
  0x8b   :  { %719 = vmatpush3.bf16.msra.mxu0 %v802_v8 }
  0x8e   :  { %721 = vmatmul.mubr.bf16.vlgmr.msra.gmra.mrb[0].mxu0 %v804_v9 }
  0x8f   :  { %724 = vmatprep.mubr.bf16.mxu0 %v805_v10 }
  0x96   :  { %725 = vmatmul.mubr.bf16.gmra.mrb[4].mxu0 %v806_v11 }
  0x97   :  { %776 = vmatprep.mubr.msk.bf16.mxu0 %vm332_vm0, %v807_v12 }
 0x161   :  { %v722_v13 = vpop.f32.mrb[0].mxu0 }
 0x162   :  { %v277_v14 = vpop.f32.mrb[1].mxu0 }
 0x163   :  { %v723_v15 = vpop.f32.mrb[2].mxu0 }
 0x164   :  { %v309_v16 = vpack.c.bf16 %v723_v15, %v722_v13  ;;  %v280_v17 = vpop.f32.mrb[3].mxu0 }
 0x165   :  { %v308_v18 = vpack.c.bf16 %v280_v17, %v277_v14 }
 0x167   :  { %728 = vmatprep.subr.bf16.mxu1 %v308_v18 }
 0x168   :  { %729 = vmatpush3.bf16.msra.mxu1 %v308_v18 }
 0x169   :  { %v726_v19 = vpop.f32.mrb[4].mxu0  ;;  %730 = vmatprep.subr.bf16.mxu1 %v309_v16 }
 0x16a   :  { %v293_v20 = vpop.f32.mrb[5].mxu0 }
 0x16b   :  { %v727_v21 = vpop.f32.mrb[6].mxu0 }
 0x16c   :  { %v311_v22 = vpack.c.bf16 %v727_v21, %v726_v19  ;;  %v296_v23 = vpop.f32.mrb[7].mxu0  ;;  %731 = vmatpush3.bf16.msra.mxu1 %v309_v16  ;;  %v163_v21 = vld [vmem:[#allocation11] sm:$0xff] }
 0x16d   :  { %v310_v24 = vpack.c.bf16 %v296_v23, %v293_v20  ;;  %v165_v20 = vld [vmem:[#allocation11 + $0x10] sm:$0xff]  ;;  %v166_v23 = vld [vmem:[#allocation11 + $0x18] sm:$0xff] }
 0x16f   :  { %732 = vmatprep.subr.bf16.mxu1 %v310_v24 }
 0x170   :  { %733 = vmatpush3.bf16.msra.mxu1 %v310_v24 }
 0x171   :  { %734 = vmatprep.subr.bf16.mxu1 %v311_v22 }
 0x174   :  { %735 = vmatpush3.bf16.msra.mxu1 %v311_v22 }
 0x175   :  { %744 = vmatprep.subr.bf16.mxu1 %v811_v25 }
 0x177   :  { %737 = vmatmul.mubr.msk.bf16.vlgmr.msra.gmra.mrb[0].mxu1 %vm332_vm0, %v1142_v26 }
 0x178   :  { %740 = vmatprep.mubr.msk.bf16.mxu1 %vm332_vm0, %v1144_v27  ;;  %745 = vmatpush3.bf16.msra.mxu1 %v811_v25 }
 0x179   :  { %746 = vmatprep.subr.bf16.mxu1 %v812_v28 }
 0x17c   :  { %747 = vmatpush3.bf16.msra.mxu1 %v812_v28  ;;  %v164_v28 = vld [vmem:[#allocation11 + $0x8] sm:$0xff] }
 0x17d   :  { %748 = vmatprep.subr.bf16.mxu1 %v813_v29 }
 0x17f   :  { %741 = vmatmul.mubr.msk.bf16.gmra.mrb[4].mxu1 %vm332_vm0, %v1150_v30 }
 0x180   :  { %749 = vmatpush3.bf16.msra.mxu1 %v813_v29 }
 0x181   :  { %750 = vmatprep.subr.bf16.mxu1 %v814_v31 }
 0x184   :  { %751 = vmatpush3.bf16.msra.mxu1 %v814_v31 }
 0x185   :  { %752 = vmatprep.subr.bf16.mxu1 %v815_v32 }
 0x188   :  { %753 = vmatpush3.bf16.msra.mxu1 %v815_v32 }
 0x189   :  { %754 = vmatprep.subr.bf16.mxu1 %v816_v33 }
 0x18c   :  { %755 = vmatpush3.bf16.msra.mxu1 %v816_v33 }
 0x18d   :  { %756 = vmatprep.subr.bf16.mxu1 %v817_v34 }
 0x190   :  { %757 = vmatpush3.bf16.msra.mxu1 %v817_v34  ;;  %v167_v34 = vld [vmem:[#allocation11 + $0x20] sm:$0xff] }
 0x191   :  { %758 = vmatprep.subr.bf16.mxu1 %v818_v35 }
 0x194   :  { %759 = vmatpush3.bf16.msra.mxu1 %v818_v35 }
 0x24a   :  { %v738_v38 = vpop.f32.mrb[0].mxu1 }
 0x24b   :  { %v388_v40 = vadd.f32 %v738_v38, %v141_v36  ;;  %v379_v41 = vpop.f32.mrb[1].mxu1  ;;  %v168_v38 = vld [vmem:[#allocation11 + $0x28] sm:$0xff] }
 0x24c   :  { %v380_v43 = vadd.f32 %v379_v41, %v139_v37  ;;  %v739_v44 = vpop.f32.mrb[2].mxu1 }
 0x24d   :  { %v391_v45 = vadd.f32 %v739_v44, %v142_v39  ;;  %v382_v46 = vpop.f32.mrb[3].mxu1  ;;  %v412_v48 = vmax.f32 %v388_v40, 0.0 }
 0x24e   :  { %v383_v47 = vadd.f32 %v382_v46, %v140_v42  ;;  %v410_v50 = vmax.f32 %v380_v43, 0.0 }
 0x24f   :  { %v413_v49 = vmax.f32 %v391_v45, 0.0 }
 0x250   :  { %v411_v51 = vmax.f32 %v383_v47, 0.0 }
 0x251   :  { %v419_v53 = vpack.c.bf16 %v413_v49, %v412_v48 }
 0x252   :  { %v418_v55 = vpack.c.bf16 %v411_v51, %v410_v50  ;;  %v742_v56 = vpop.f32.mrb[4].mxu1 }
 0x253   :  { %v404_v58 = vadd.f32 %v742_v56, %v145_v52  ;;  %v395_v59 = vpop.f32.mrb[5].mxu1 }
 0x254   :  { %v396_v61 = vadd.f32 %v395_v59, %v143_v54  ;;  %v743_v62 = vpop.f32.mrb[6].mxu1  ;;  %760 = vmatprep.mubr.bf16.mxu1 %v418_v55 }
 0x255   :  { %v407_v63 = vadd.f32 %v743_v62, %v146_v57  ;;  %v398_v0 = vpop.f32.mrb[7].mxu1  ;;  %761 = vmatmul.mubr.bf16.vlgmr.msra.gmra.mrb[8].mxu1 %v419_v53  ;;  %v416_v2 = vmax.f32 %v404_v58, 0.0 }
 0x256   :  { %v399_v1 = vadd.f32 %v398_v0, %v144_v60  ;;  %v414_v4 = vmax.f32 %v396_v61, 0.0 }
 0x257   :  { %v417_v3 = vmax.f32 %v407_v63, 0.0 }
 0x258   :  { %v415_v5 = vmax.f32 %v399_v1, 0.0 }
 0x259   :  { %v421_v6 = vpack.c.bf16 %v417_v3, %v416_v2 }
 0x25a   :  { %v420_v7 = vpack.c.bf16 %v415_v5, %v414_v4 }
 0x25c   :  { %764 = vmatprep.mubr.bf16.mxu1 %v420_v7 }
 0x25d   :  { %765 = vmatmul.mubr.bf16.gmra.mrb[12].mxu1 %v421_v6 }
 0x328   :  { %v762_v8 = vpop.f32.mrb[8].mxu1 }
 0x329   :  { %v504_v9 = vpop.f32.mrb[9].mxu1 }
 0x32a   :  { %v763_v10 = vpop.f32.mrb[10].mxu1 }
 0x32b   :  { %v536_v11 = vpack.c.bf16 %v763_v10, %v762_v8  ;;  %v507_v12 = vpop.f32.mrb[11].mxu1 }
 0x32c   :  { %v535_v13 = vpack.c.bf16 %v507_v12, %v504_v9 }
 0x32e   :  { %768 = vmatprep.subr.bf16.mxu0 %v535_v13 }
 0x32f   :  { %769 = vmatpush3.bf16.msra.mxu0 %v535_v13 }
 0x330   :  { %v766_v14 = vpop.f32.mrb[12].mxu1  ;;  %770 = vmatprep.subr.bf16.mxu0 %v536_v11 }
 0x331   :  { %v520_v15 = vpop.f32.mrb[13].mxu1 }
 0x332   :  { %v767_v16 = vpop.f32.mrb[14].mxu1 }
 0x333   :  { %v538_v17 = vpack.c.bf16 %v767_v16, %v766_v14  ;;  %v523_v18 = vpop.f32.mrb[15].mxu1  ;;  %771 = vmatpush3.bf16.msra.mxu0 %v536_v11 }
 0x334   :  { %v537_v19 = vpack.c.bf16 %v523_v18, %v520_v15 }
 0x336   :  { %772 = vmatprep.subr.bf16.mxu0 %v537_v19 }
 0x337   :  { %773 = vmatpush3.bf16.msra.mxu0 %v537_v19 }
 0x338   :  { %774 = vmatprep.subr.bf16.mxu0 %v538_v17 }
 0x33b   :  { %775 = vmatpush3.bf16.msra.mxu0 %v538_v17 }
 0x33e   :  { %777 = vmatmul.mubr.msk.bf16.vlgmr.msra.gmra.mrb[8].mxu0 %vm332_vm0, %v1142_v26 }
 0x33f   :  { %780 = vmatprep.mubr.msk.bf16.mxu0 %vm332_vm0, %v1144_v27  ;;  %v169_v27 = vld [vmem:[#allocation11 + $0x30] sm:$0xff] }
 0x346   :  { %781 = vmatmul.mubr.msk.bf16.gmra.mrb[12].mxu0 %vm332_vm0, %v1150_v30  ;;  %v170_v30 = vld [vmem:[#allocation11 + $0x38] sm:$0xff] }
 0x411   :  { %v778_v22 = vpop.f32.mrb[8].mxu0 }
 0x412   :  { %v582_v24 = vadd.f32 %v778_v22, %v165_v20  ;;  %v573_v25 = vpop.f32.mrb[9].mxu0 }
 0x413   :  { %v574_v29 = vadd.f32 %v573_v25, %v163_v21  ;;  %v779_v31 = vpop.f32.mrb[10].mxu0 }
 0x414   :  { %606 = vst [vmem:[#allocation13 + $0x10] sm:$0xff] %v582_v24  ;;  %v585_v32 = vadd.f32 %v779_v31, %v166_v23  ;;  %v576_v33 = vpop.f32.mrb[11].mxu0 }
 0x415   :  { %604 = vst [vmem:[#allocation13] sm:$0xff] %v574_v29  ;;  %v577_v26 = vadd.f32 %v576_v33, %v164_v28 }
 0x416   :  { %607 = vst [vmem:[#allocation13 + $0x18] sm:$0xff] %v585_v32 }
 0x417   :  { %605 = vst [vmem:[#allocation13 + $0x8] sm:$0xff] %v577_v26 }
 0x419   :  { %v782_v35 = vpop.f32.mrb[12].mxu0 }
 0x41a   :  { %v598_v36 = vadd.f32 %v782_v35, %v169_v27  ;;  %v589_v37 = vpop.f32.mrb[13].mxu0 }
 0x41b   :  { %v590_v39 = vadd.f32 %v589_v37, %v167_v34  ;;  %v783_v40 = vpop.f32.mrb[14].mxu0 }
 0x41c   :  { %610 = vst [vmem:[#allocation13 + $0x30] sm:$0xff] %v598_v36  ;;  %v601_v41 = vadd.f32 %v783_v40, %v170_v30  ;;  %v592_v42 = vpop.f32.mrb[15].mxu0 }
 0x41d   :  { %608 = vst [vmem:[#allocation13 + $0x20] sm:$0xff] %v590_v39  ;;  %v593_v43 = vadd.f32 %v592_v42, %v168_v38 }
 0x41e   :  { %611 = vst [vmem:[#allocation13 + $0x38] sm:$0xff] %v601_v41 }
 0x41f   :  { %609 = vst [vmem:[#allocation13 + $0x28] sm:$0xff] %v593_v43 }
 0x420   :  { %962 = shalt.err (!%p959_p10)
}
 0x421   :  { %s963_s27 = scalar_lea.hbm %s1181_s6, 1024 }
 0x422   :  { %p964_p11 = scmp.ne.s32.totalorder %s1181_s6, %s963_s27  ;;  %p967_p12 = scmp.lt.u32.totalorder %s963_s27, %s1181_s6 }
 0x424   :  { %p969_p13 = pnand %p967_p12, %p964_p11 }
 0x426   :  { %972 = shalt.err (!%p969_p13)
}
 0x427   :  { %623 = dma.vmem_to_hbm [thread:$0]  %s618_s10, 1024, %s1181_s6, [#allocation4], %s987_s1, %s987_s1, %s988_s21  }
 0x428   :  { %981 = dma.done.wait [#allocation4], 1024  }
 0x429   :  { %982 = vsyncadd [#allocation4], 4294966272 }
 0x42a   :  { %627 = vsyncpa [#allocation3], 1 }
 0x42b   :  { %628 = vsyncpa [#allocation6], 1 }
 0x42c   :  { %629 = vsyncpa [#allocation9], 1 }
 0x42d   :  { %630 = vsyncpa [#allocation12], 1 }
 0x42e   :  { %631 = vsyncpa [#allocation4], 1 }

</bundles_post_ra>
